<compile_context>
chip_gen: v7x
topology: tpu7x:2x2x1
jax: 0.10.0
libtpu: 0.0.40
codegen_flags: <defaults>
</compile_context>

<pallas_src>
import jax
import jax.numpy as jnp
from jax.experimental import pallas as pl
from jax.experimental.pallas import tpu as pltpu

IGNORE_INDEX = -100
_LANES = 128
_UNROLL_MAX = 8  # python-unroll the class-chunk loop up to this many middle chunks


def _round_up(x, m):
    return (x + m - 1) // m * m


def _make_ce_kernel(C, HW, tile, chunk_sublanes, ignore_index):
    CH = chunk_sublanes

    def kernel(logits_ref, tgt_ref, out_ref):
        # logits_ref: (1, C, tile)   native dtype
        # tgt_ref:    (1, 1, tile)   int32
        # out_ref:    (1, 128)       f32; lane 0 = partial loss sum, lane 1 = valid count
        j = pl.program_id(1)
        t = tgt_ref[0]                                              # (1, tile) int32
        lane = jax.lax.broadcasted_iota(jnp.int32, (1, tile), 1)
        in_bounds = (j * tile + lane) < HW                          # mask ragged tail
        valid = jnp.logical_and(t != ignore_index, in_bounds)

        def scan_chunk(c0, ch, carry):
            # One class chunk: fused online max / rescaled exp-sum / target-logit select.
            xc = logits_ref[0, pl.ds(c0, ch), :].astype(jnp.float32)     # (ch, tile)
            cls = jax.lax.broadcasted_iota(jnp.int32, (ch, tile), 0) + c0
            hit = jnp.sum(jnp.where(cls == t, xc, 0.0), axis=0, keepdims=True)  # exact
            mc = jnp.max(xc, axis=0, keepdims=True)
            if carry is None:
                s0 = jnp.sum(jnp.exp(xc - mc), axis=0, keepdims=True)
                return mc, s0, hit
            m, s, xt = carry
            m_new = jnp.maximum(m, mc)
            s_new = s * jnp.exp(m - m_new) + jnp.sum(jnp.exp(xc - m_new),
                                                     axis=0, keepdims=True)
            return m_new, s_new, xt + hit

        # Static chunk schedule over the class dim (C is a trace-time constant).
        ch0 = min(CH, C)
        carry = scan_chunk(0, ch0, None)
        n_mid = (C - ch0) // CH
        tail = (C - ch0) % CH

        if n_mid > 0:
            if n_mid <= _UNROLL_MAX:
                for i in range(n_mid):
                    carry = scan_chunk(ch0 + i * CH, CH, carry)
            else:
                def body(i, c):
                    c0 = pl.multiple_of(ch0 + i * CH, 8)
                    return scan_chunk(c0, CH, c)
                carry = jax.lax.fori_loop(0, n_mid, body, carry)
        if tail > 0:
            carry = scan_chunk(C - tail, tail, carry)

        m, s, xt = carry
        # loss = (m + log(sum exp(x - m))) - x[target]; never materialize log_softmax.
        per = jnp.where(valid, (m + jnp.log(s)) - xt, 0.0)          # (1, tile)
        loss_sum = jnp.sum(per)
        cnt = jnp.sum(valid.astype(jnp.float32))

        lane_o = jax.lax.broadcasted_iota(jnp.int32, (1, _LANES), 1)
        out_ref[...] = jnp.where(lane_o == 0, loss_sum,
                                 jnp.where(lane_o == 1, cnt, 0.0))

    return kernel


def cross_entropy_loss(logits_nchw, target_nhw, *, block_bytes=2 * 1024 * 1024):
    """CrossEntropyLoss(weight=None, ignore_index=-100, reduction='mean').

    logits_nchw: float (N, C, H, W)
    target_nhw:  int   (N, H, W)
    Returns a scalar float32 loss.
    NOTE: targets outside [0, C) other than -100 contribute loss = logsumexp(x)
          (x[target] treated as 0) instead of raising like PyTorch.
    NOTE: if every target is IGNORE_INDEX the result is 0/0 -> NaN (matches PyTorch).
    """
    N, C, H, W = logits_nchw.shape
    HW = H * W
    itemsize = jnp.dtype(logits_nchw.dtype).itemsize
    CH = max(8, 32 // itemsize)          # class-chunk sublanes: 8 f32, 16 bf16, 32 int8

    # --- spatial tile sized by bytes: aim for ~block_bytes of logits per grid step,
    #     capped so double-buffered inputs + chunk temporaries fit a v7x-safe budget. ---
    tile = max(_LANES, block_bytes // max(1, C * itemsize))
    per_lane_bytes = (2 * C * itemsize   # double-buffered logits block
                      + 2 * 8 * 4        # double-buffered (1,1,tile) i32 target (8-sublane pad)
                      + 8 * CH * 4)      # headroom for chunk-sized f32 temporaries
    vmem_budget = 36 * 1024 * 1024       # working set << 64 MiB physical VMEM on v7x
    tile = min(tile, vmem_budget // per_lane_bytes)
    tile = min(tile, _round_up(HW, _LANES))         # no bigger than the data
    tile = max(_LANES, (tile // _LANES) * _LANES)   # lane multiple

    n_hw = pl.cdiv(HW, tile)
    n_tiles = N * n_hw

    # NCHW-native: pure reshapes, no transpose, no padding (ragged tail masked in-kernel).
    logits = logits_nchw.reshape(N, C, HW)
    target = target_nhw.reshape(N, 1, HW).astype(jnp.int32)

    kernel = _make_ce_kernel(C, HW, tile, CH, IGNORE_INDEX)

    partials = pl.pallas_call(
        kernel,
        out_shape=jax.ShapeDtypeStruct((1, n_tiles * _LANES), jnp.float32),
        grid_spec=pltpu.PrefetchScalarGridSpec(
            num_scalar_prefetch=0,
            grid=(N, n_hw),
            in_specs=[
                pl.BlockSpec((1, C, tile), lambda n, j: (n, 0, j)),
                pl.BlockSpec((1, 1, tile), lambda n, j: (n, 0, j)),
            ],
            out_specs=pl.BlockSpec((1, _LANES), lambda n, j: (0, n * n_hw + j)),
        ),
        compiler_params=pltpu.CompilerParams(
            dimension_semantics=("parallel", "parallel"),
            # Above v5e's 16 MiB scoped default, safely under v7x's 64 MiB physical VMEM.
            vmem_limit_bytes=48 * 1024 * 1024,
        ),
    )(logits, target)

    p = partials.reshape(n_tiles, _LANES)
    total = jnp.sum(p[:, 0])
    count = jnp.sum(p[:, 1])
    # reduction='mean': sum over non-ignored elements / count of non-ignored elements.
    return (total / count).astype(jnp.float32)


def _reference(logits_nchw, target_nhw):
    # Pure-JAX reference matching torch.nn.CrossEntropyLoss semantics.
    N, C, H, W = logits_nchw.shape
    x = jnp.transpose(logits_nchw, (0, 2, 3, 1)).reshape(-1, C).astype(jnp.float32)
    t = target_nhw.reshape(-1)
    logp = jax.nn.log_softmax(x, axis=-1)
    valid = t != IGNORE_INDEX
    safe_t = jnp.where(valid, t, 0)
    picked = jnp.take_along_axis(logp, safe_t[:, None], axis=-1)[:, 0]
    per = jnp.where(valid, -picked, 0.0)
    return jnp.sum(per) / jnp.sum(valid.astype(jnp.float32))


def _run_case(key, N, C, H, W, ignore_p, **kwargs):
    k1, k2, k3 = jax.random.split(key, 3)
    logits = jax.random.normal(k1, (N, C, H, W), dtype=jnp.float32)
    target = jax.random.randint(k2, (N, H, W), 0, C, dtype=jnp.int32)
    ignore_mask = jax.random.uniform(k3, (N, H, W)) < ignore_p
    target = jnp.where(ignore_mask, IGNORE_INDEX, target)

    loss = cross_entropy_loss(logits, target, **kwargs)
    jax.block_until_ready(loss)
    ref = _reference(logits, target)
    assert jnp.allclose(loss, ref, atol=1e-5, rtol=1e-5), (N, C, H, W, loss, ref)


if __name__ == "__main__":
    # TODO(synk): the PyTorch forward passes `alpha` positionally into the `weight`
    # slot while also passing `weight=self.weight` (a duplicate-kwarg bug); we
    # implement the weight=None / alpha=None path (the module's default config).
    key = jax.random.PRNGKey(0)
    k_a, k_b, k_c = jax.random.split(key, 3)

    # Case 1 (the module's implied small shape): single class chunk, single spatial tile.
    _run_case(k_a, N=2, C=4, H=16, W=16, ignore_p=0.1)

    # Case 2: exercises class chunking (unrolled mid chunk + partial tail), a multi-tile
    # spatial grid, and the in-kernel ragged-tail mask (HW=400 with tile forced to 128).
    _run_case(k_b, N=2, C=20, H=20, W=20, ignore_p=0.1, block_bytes=1024)

    # Case 3: exercises the fori_loop class-chunk path (C=83 -> 9 middle chunks + tail).
    _run_case(k_c, N=1, C=83, H=8, W=16, ignore_p=0.1)

    print("KERNEL_OK")
</pallas_src>

<mosaic_0001>
module attributes {stable_mosaic.version = 11 : i64} {
  func.func @kernel(%arg0: i32, %arg1: i32, %arg2: memref<1x4x256xf32, #tpu.memory_space<vmem>>, %arg3: memref<1x1x256xi32, #tpu.memory_space<vmem>>, %arg4: memref<1x128xf32, #tpu.memory_space<vmem>>) attributes {dimension_semantics = [#tpu.dimension_semantics<parallel>, #tpu.dimension_semantics<parallel>], iteration_bounds = array<i64: 2, 1>, scalar_prefetch = 0 : i64, scratch_operands = 0 : i64, tpu.core_type = #tpu.core_type<tc>, window_params = [{transform_indices = @transform_0, window_bounds = array<i64: 1, 4, 256>}, {transform_indices = @transform_1, window_bounds = array<i64: 1, 1, 256>}, {transform_indices = @transform_2, window_bounds = array<i64: 1, 128>}]} {
    %c0 = arith.constant 0 : index
    %c0_0 = arith.constant 0 : index
    %c0_1 = arith.constant 0 : index
    %0 = vector.load %arg3[%c0, %c0_0, %c0_1] : memref<1x1x256xi32, #tpu.memory_space<vmem>>, vector<1x1x256xi32>
    %1 = vector.shape_cast %0 : vector<1x1x256xi32> to vector<1x256xi32>
    %2 = tpu.iota {dimensions = array<i32: 1>} : vector<1x256xi32>
    %c256_i32 = arith.constant 256 : i32
    %3 = arith.muli %arg1, %c256_i32 : i32
    %4 = vector.broadcast %3 : i32 to vector<1x256xi32>
    %5 = arith.addi %4, %2 : vector<1x256xi32>
    %c256_i32_2 = arith.constant 256 : i32
    %6 = vector.broadcast %c256_i32_2 : i32 to vector<1x256xi32>
    %7 = arith.cmpi slt, %5, %6 : vector<1x256xi32>
    %c-100_i32 = arith.constant -100 : i32
    %8 = vector.broadcast %c-100_i32 : i32 to vector<1x256xi32>
    %9 = arith.cmpi ne, %1, %8 : vector<1x256xi32>
    %10 = arith.andi %9, %7 : vector<1x256xi1>
    %c0_3 = arith.constant 0 : index
    %c0_4 = arith.constant 0 : index
    %c0_5 = arith.constant 0 : index
    %11 = vector.load %arg2[%c0_3, %c0_4, %c0_5] : memref<1x4x256xf32, #tpu.memory_space<vmem>>, vector<1x4x256xf32>
    %12 = vector.shape_cast %11 : vector<1x4x256xf32> to vector<4x256xf32>
    %13 = tpu.iota {dimensions = array<i32: 0>} : vector<4x256xi32>
    %c0_i32 = arith.constant 0 : i32
    %14 = vector.broadcast %c0_i32 : i32 to vector<4x256xi32>
    %15 = arith.addi %13, %14 : vector<4x256xi32>
    %16 = vector.broadcast %1 : vector<1x256xi32> to vector<4x256xi32>
    %17 = arith.cmpi eq, %15, %16 : vector<4x256xi32>
    %cst = arith.constant 0.000000e+00 : f32
    %18 = vector.broadcast %cst : f32 to vector<4x256xf32>
    %19 = arith.select %17, %12, %18 : vector<4x256xi1>, vector<4x256xf32>
    %cst_6 = arith.constant dense<0.000000e+00> : vector<256xf32>
    %20 = vector.multi_reduction <add>, %19, %cst_6 [0] : vector<4x256xf32> to vector<256xf32>
    %21 = vector.shape_cast %20 : vector<256xf32> to vector<1x256xf32>
    %cst_7 = arith.constant dense<0xFF800000> : vector<256xf32>
    %22 = vector.multi_reduction <maximumf>, %12, %cst_7 [0] : vector<4x256xf32> to vector<256xf32>
    %23 = vector.shape_cast %22 : vector<256xf32> to vector<1x256xf32>
    %24 = vector.broadcast %23 : vector<1x256xf32> to vector<4x256xf32>
    %25 = arith.subf %12, %24 : vector<4x256xf32>
    %26 = math.exp %25 : vector<4x256xf32>
    %cst_8 = arith.constant dense<0.000000e+00> : vector<256xf32>
    %27 = vector.multi_reduction <add>, %26, %cst_8 [0] : vector<4x256xf32> to vector<256xf32>
    %28 = vector.shape_cast %27 : vector<256xf32> to vector<1x256xf32>
    %29 = math.log %28 : vector<1x256xf32>
    %30 = arith.addf %23, %29 : vector<1x256xf32>
    %31 = arith.subf %30, %21 : vector<1x256xf32>
    %cst_9 = arith.constant 0.000000e+00 : f32
    %32 = vector.broadcast %cst_9 : f32 to vector<1x256xf32>
    %33 = arith.select %10, %31, %32 : vector<1x256xi1>, vector<1x256xf32>
    %34 = vector.shape_cast %33 : vector<1x256xf32> to vector<1x1x256xf32>
    %cst_10 = arith.constant dense<0.000000e+00> : vector<1xf32>
    %35 = vector.multi_reduction <add>, %34, %cst_10 [1, 2] : vector<1x1x256xf32> to vector<1xf32>
    %36 = vector.shape_cast %35 : vector<1xf32> to vector<1x1x1xf32>
    %37 = vector.extract %36[0, 0, 0] : f32 from vector<1x1x1xf32>
    %38 = arith.extui %10 : vector<1x256xi1> to vector<1x256xi32>
    %39 = arith.sitofp %38 : vector<1x256xi32> to vector<1x256xf32>
    %40 = vector.shape_cast %39 : vector<1x256xf32> to vector<1x1x256xf32>
    %cst_11 = arith.constant dense<0.000000e+00> : vector<1xf32>
    %41 = vector.multi_reduction <add>, %40, %cst_11 [1, 2] : vector<1x1x256xf32> to vector<1xf32>
    %42 = vector.shape_cast %41 : vector<1xf32> to vector<1x1x1xf32>
    %43 = vector.extract %42[0, 0, 0] : f32 from vector<1x1x1xf32>
    %44 = tpu.iota {dimensions = array<i32: 1>} : vector<1x128xi32>
    %c0_i32_12 = arith.constant 0 : i32
    %45 = vector.broadcast %c0_i32_12 : i32 to vector<1x128xi32>
    %46 = arith.cmpi eq, %44, %45 : vector<1x128xi32>
    %c1_i32 = arith.constant 1 : i32
    %47 = vector.broadcast %c1_i32 : i32 to vector<1x128xi32>
    %48 = arith.cmpi eq, %44, %47 : vector<1x128xi32>
    %cst_13 = arith.constant 0.000000e+00 : f32
    %49 = vector.broadcast %43 : f32 to vector<1x128xf32>
    %50 = vector.broadcast %cst_13 : f32 to vector<1x128xf32>
    %51 = arith.select %48, %49, %50 : vector<1x128xi1>, vector<1x128xf32>
    %52 = vector.broadcast %37 : f32 to vector<1x128xf32>
    %53 = arith.select %46, %52, %51 : vector<1x128xi1>, vector<1x128xf32>
    %c0_14 = arith.constant 0 : index
    %c0_15 = arith.constant 0 : index
    %54 = vector.load %arg4[%c0_14, %c0_15] : memref<1x128xf32, #tpu.memory_space<vmem>>, vector<1x128xf32>
    tpu.vector_store %arg4[%c0_14, %c0_15], %53 {strides = array<i32>} : memref<1x128xf32, #tpu.memory_space<vmem>>, vector<1x128xf32>,
    return
  }
  func.func @transform_0(%arg0: i32, %arg1: i32) -> (i32, i32, i32) {
    %c0_i32 = arith.constant 0 : i32
    %c0_i32_0 = arith.constant 0 : i32
    return %arg0, %c0_i32, %arg1 : i32, i32, i32
  }
  func.func @transform_1(%arg0: i32, %arg1: i32) -> (i32, i32, i32) {
    %c0_i32 = arith.constant 0 : i32
    %c0_i32_0 = arith.constant 0 : i32
    return %arg0, %c0_i32, %arg1 : i32, i32, i32
  }
  func.func @transform_2(%arg0: i32, %arg1: i32) -> (i32, i32) {
    %c1_i32 = arith.constant 1 : i32
    %0 = arith.muli %arg0, %c1_i32 : i32
    %1 = arith.addi %0, %arg1 : i32
    %c0_i32 = arith.constant 0 : i32
    %c0_i32_0 = arith.constant 0 : i32
    return %c0_i32, %1 : i32, i32
  }
}

</mosaic_0001>

<bundles_post_ra>
// kernel: tpu_custom_call.1
= control target key start
LH: loop header
LB: loop body
LE: loop exit
PB: predicated region body
PF: predicated region fallthrough
CT: control target
= control target key end

     0   :  { %7 = vsyncpa [#allocation3], 0  ;;  %s1027_s0 = inlined_call_operand.hbm [shape: f32[2,4,256], index: 0, kind: input, shape index: {}]   ;;  %s1028_s1 = inlined_call_operand.hbm [shape: s32[2,1,256], index: 1, kind: input, shape index: {}]   ;;  %s1029_s2 = inlined_call_operand.hbm [shape: f32[1,256], index: 2, kind: output, shape index: {}]  }
   0x1   :  { %9 = vsyncpa [#allocation3 + $0x1], 0 }
   0x2   :  { %10 = vsyncpa [#allocation6], 0 }
   0x3   :  { %12 = vsyncpa [#allocation6 + $0x1], 0 }
   0x4   :  { %13 = vsyncpa [#allocation4], 0 }
   0x5   :  { %15 = vsyncpa [#allocation4 + $0x1], 0  ;;  %s793_s9 = smov 0   ;;  %s795_s10 = smov 0  }
   0x6   :  { %s797_s11 = smov 0   ;;  %s799_s12 = smov 0  }
   0x7   :  { %s801_s13 = smov 0   ;;  %s803_s14 = smov 0  }
   0x8 LB: > { %s524_s15 = sadd.s32 4294967295, %s770_s14   ;;  %s525_s16 = sadd.s32 4294967294, %s770_s14   ;;  %s770_s14 = sphi %s803_s14, %s21_s14   ;;  %s766_s13 = sphi %s801_s13, %s1049_s13   ;;  %s762_s12 = sphi %s799_s12, %s1048_s12   ;;  %s758_s11 = sphi %s797_s11, %s1047_s11   ;;  %s754_s10 = sphi %s795_s10, %s1046_s10   ;;  %s750_s9 = sphi %s793_s9, %s1045_s9  }
   0x9   : > { %s33_s17 = sadd.s32 1, %s766_s13  ;;  %s42_s18 = sadd.s32 1, %s758_s11 }
   0xa   : > { %p35_p0 = scmp.ge.s32.totalorder %s33_s17, 2  ;;  %p49_p1 = scmp.ne.s32.totalorder %s758_s11, %s754_s10 }
   0xb   : > { %p50_p2 = scmp.eq.s32.totalorder %s770_s14, 0  ;;  %p55_p3 = scmp.ne.s32.totalorder %s754_s10, %s750_s9 }
   0xc   : > { %s1051_s17 = smov (%p35_p0, %s33_s17), 0  ;;  %p56_p5 = scmp.eq.s32.totalorder %s524_s15, 0 }
   0xd   : > { %p834_p4 = por %p50_p2, %p49_p1  ;;  %s37_s20 = ssub.s32 %s766_s13, %s1051_s17 }
   0xe   : > { %p109_p6 = scmp.eq.s32.totalorder %s524_s15, 1  ;;  %p40_p7 = scmp.eq.s32.totalorder %s37_s20, 0 }
   0xf   : > { %p840_p8 = por %p56_p5, %p55_p3  ;;  %p115_p10 = scmp.eq.s32.totalorder %s525_s16, 1 }
  0x10   : > { %p844_p9 = por %p109_p6, %p49_p1  ;;  %p564_p13 = scmp.lt.s32.totalorder %s770_s14, 2 }
  0x11   : > { %s1033_s21 = scalar_select %p840_p8, 1, 0 }
  0x12   : > { %s1034_s22 = scalar_select %p844_p9, 1, 0 }
  0x13   : > { %s849_s23 = scalar_select %p40_p7, %s758_s11, %s42_s18  }
  0x14   : > { %p851_p11 = por %p115_p10, %p55_p3  ;;  %s858_s25 = sand.u32 1, %s758_s11  }
  0x15   : > { %s528_s26 = sshll.u32 %s858_s25, 3  ;;  %s541_s27 = sshll.u32 %s766_s13, 7 }
  0x16   : > { %s1035_s24 = scalar_select %p851_p11, 1, 0 }
  0x17   : > { %s865_s30 = scalar_lea.hbm %s1027_s0, %s541_s27  ;;  %s139_s3 = scalar_lea.vmem [#allocation2], %s528_s26 }
  0x18   : > { %s149_s4 = sshll.u32 %s139_s3, 4  ;;  %p871_p0 = pnand %p564_p13, %p834_p4  ;;  %s867_s4 = int_to_ptr.vmem [resolvable:$true] %s149_s4 }
  0x19   : > { %s136_s6 = scalar_lea.sflag [#allocation3], %s858_s25  ;;  %s624_s7 = scalar_lea.hbm %s865_s30, 128 }
  0x1a   : > { %p625_p3 = scmp.ne.s32.totalorder %s865_s30, %s624_s7  ;;  %p626_p5 = pneg %p871_p0 }
  0x1b   : > { %s629_s16 = scalar_lea.hbm %s1027_s0, 256  ;;  %p630_p4 = scmp.lt.u32.totalorder %s865_s30, %s1027_s0 }
  0x1c   : > { %p627_p6 = pnand %p626_p5, %p625_p3  ;;  %p631_p10 = scmp.lt.u32.totalorder %s629_s16, %s624_s7 }
  0x1d   : > { %p633_p12 = scmp.lt.u32.totalorder %s624_s7, %s865_s30 }
  0x1e   : > { %p628_p7 = pneg %p627_p6  ;;  %p632_p13 = por %p631_p10, %p630_p4 }
  0x20   : > { %p634_p1 = por %p633_p12, %p632_p13 }
  0x22   : > { %p635_p2 = pnand %p634_p1, %p628_p7 }
  0x24   : > { %638 = shalt.err (!%p635_p2)
}
  0x25   : > { %s639_s20 = scalar_lea.vmem %s867_s4, 128  ;;  %s772_s26 = smov [#allocation2]  }
  0x26   : > { %p640_p3 = scmp.ne.s32.totalorder %s867_s4, %s639_s20  ;;  %s644_s27 = sshll.u32 %s772_s26, 4  ;;  %s645_s27 = int_to_ptr.vmem [resolvable:$false] %s644_s27 }
  0x27   : > { %s646_s28 = scalar_lea.vmem %s645_s27, 256  ;;  %p647_p9 = scmp.lt.s32.totalorder %s867_s4, %s645_s27 }
  0x28   : > { %p642_p6 = pnand %p640_p3, %p626_p5  ;;  %p648_p4 = scmp.lt.s32.totalorder %s646_s28, %s639_s20 }
  0x2a   : > { %p643_p11 = pneg %p642_p6  ;;  %p649_p10 = por %p648_p4, %p647_p9 }
  0x2c   : > { %p650_p12 = pnand %p649_p10, %p643_p11 }
  0x2e   : > { %653 = shalt.err (!%p650_p12)
}
  0x2f   : > { %556 = dma.hbm_to_vmem [thread:$0]  (!%p871_p0), %s865_s30, 128, %s867_s4, %s136_s6  }
  0x30   : > { %p1037_p1 = scmp.lt.s32.totalorder %s770_s14, 3  ;;  %p1038_p2 = scmp.ge.s32.totalorder %s770_s14, 1 }
  0x31   : > { %s531_s3 = sshll.u32 %s858_s25, 1  ;;  %s542_s7 = sshll.u32 %s766_s13, 5 }
  0x32   : > { %p907_p7 = pnand %p1038_p2, %p1037_p1  ;;  %s916_s16 = scalar_lea.hbm %s1028_s1, %s542_s7 }
  0x33   : > { %s160_s18 = scalar_lea.vmem [#allocation5], %s531_s3  ;;  %s157_s30 = scalar_lea.sflag [#allocation6], %s858_s25 }
  0x34   : > { %s1039_s29 = scalar_select %p907_p7, 1, 0 }
  0x35   : > { %s170_s19 = sshll.u32 %s160_s18, 4  ;;  %s654_s4 = scalar_lea.hbm %s916_s16, 32  ;;  %s171_s19 = int_to_ptr.vmem [resolvable:$true] %s170_s19 }
  0x36   : > { %p655_p9 = scmp.ne.s32.totalorder %s916_s16, %s654_s4  ;;  %s659_s26 = scalar_lea.hbm %s1028_s1, 64 }
  0x37   : > { %p660_p3 = scmp.lt.u32.totalorder %s916_s16, %s1028_s1  ;;  %p661_p6 = scmp.lt.u32.totalorder %s659_s26, %s654_s4 }
  0x38   : > { %p657_p11 = pnand %p655_p9, %p626_p5  ;;  %p663_p10 = scmp.lt.u32.totalorder %s654_s4, %s916_s16 }
  0x39   : > { %p662_p4 = por %p661_p6, %p660_p3 }
  0x3a   : > { %p658_p13 = pneg %p657_p11 }
  0x3b   : > { %p664_p12 = por %p663_p10, %p662_p4 }
  0x3d   : > { %p665_p1 = pnand %p664_p12, %p658_p13 }
  0x3f   : > { %668 = shalt.err (!%p665_p1)
}
  0x40   : > { %s669_s25 = scalar_lea.vmem %s171_s19, 32  ;;  %s773_s3 = smov [#allocation5]  }
  0x41   : > { %p670_p2 = scmp.ne.s32.totalorder %s171_s19, %s669_s25  ;;  %s674_s7 = sshll.u32 %s773_s3, 4  ;;  %s675_s7 = int_to_ptr.vmem [resolvable:$false] %s674_s7 }
  0x42   : > { %s676_s8 = scalar_lea.vmem %s675_s7, 64  ;;  %p677_p8 = scmp.lt.s32.totalorder %s171_s19, %s675_s7 }
  0x43   : > { %p672_p9 = pnand %p670_p2, %p626_p5  ;;  %p678_p7 = scmp.lt.s32.totalorder %s676_s8, %s669_s25 }
  0x45   : > { %p673_p11 = pneg %p672_p9  ;;  %p679_p3 = por %p678_p7, %p677_p8 }
  0x47   : > { %p680_p6 = pnand %p679_p3, %p673_p11 }
  0x49   : > { %683 = shalt.err (!%p680_p6)
}
  0x4a   : > { %559 = dma.hbm_to_vmem [thread:$0]  (!%p871_p0), %s916_s16, 32, %s171_s19, %s157_s30  }
  0x4b   : > { %p1040_p13 = scmp.ne.s32.totalorder %s1039_s29, 0 }
  0x4c   : > { %s941_s15 = sand.u32 (!%p1040_p13), 1, %s754_s10   ;;  %p1041_p5 = scmp.ne.s32.totalorder (!%p1040_p13), %s1033_s21, 0 }
  0x4d   : > { %179 = sbr.rel (%p1040_p13) target bundleno = 390 (0x186), region = 28  ;;  %s535_s18 = sshll.u32 (!%p1040_p13), %s941_s15, 3 }
  0x4e   : > { %s182_s4 = scalar_lea.sflag (!%p1040_p13), [#allocation3], %s941_s15  ;;  %s185_s6 = scalar_lea.vmem (!%p1040_p13), [#allocation2], %s535_s18 }
  0x54   : > { %737 = dma.done.wait (%p1041_p5), %s182_s4, 128  }
  0x55   : > { %739 = vsyncadd (%p1041_p5), %s182_s4, 4294967168  ;;  %s536_s5 = sshll.u32 %s941_s15, 1  ;;  %s191_s29 = scalar_lea.sflag [#allocation6], %s941_s15 }
  0x56   : > { %s194_s16 = scalar_lea.vmem [#allocation5], %s536_s5 }
  0x57   : > { %741 = dma.done.wait (%p1041_p5), %s191_s29, 32  }
  0x58   : > { %743 = vsyncadd (%p1041_p5), %s191_s29, 4294967264  ;;  %vm270_vm0 = vcmask 1043456   ;;  %v252_v0 = vld [vmem:[%s185_s6] sm:$0xff]  ;;  %v223_v13 = vlaneseq  ;;  %v222_v22 = vld [vmem:[%s194_s16] sm:$0x3]  ;;  %v775_v56 = vmov 1  }
  0x59   : > { %v266_v1 = vcombine.high %v252_v0, %v252_v0  ;;  %v285_v2 = vsel %vm270_vm0, %v252_v0, -inf  ;;  %v774_v46 = vmov 1966171168   ;;  %v235_v57 = vcombine.low %v775_v56, %v775_v56  ;;  %s538_s21 = sshll.u32 %s762_s12, 4  ;;  %s218_s30 = scalar_lea.vmem [#allocation7], %s941_s15 }
  0x5a   : > { %v286_v3 = vrot.slane %v285_v2, 4  ;;  %v240_v17 = vshrl.u32 %v223_v13, 7  ;;  %v237_v47 = vunpack.c.l.s4 %v774_v46  ;;  %vm232_vm3 = vcmp.ne.s32.totalorder %v222_v22, 4294967196  ;;  %s420_s20 = sshll.u32 %s218_s30, 4  ;;  %s978_s25 = scalar_lea.hbm %s1029_s2, %s538_s21  ;;  %s980_s20 = int_to_ptr.vmem [resolvable:$true] %s420_s20 }
  0x5b   : > { %v292_v4 = vsel %vm270_vm0, %v266_v1, -inf  ;;  %vm361_vm6 = vcmask 1040384   ;;  %s407_s12 = scalar_lea.sflag [#allocation4], %s941_s15  ;;  %s684_s3 = scalar_lea.vmem %s980_s20, 16 }
  0x5c   : > { %v293_v5 = vrot.slane %v292_v4, 4  ;;  %v287_v6 = vmax.f32 %v285_v2, %v286_v3  ;;  %v958_v20 = vsub.s32 0, %v240_v17  ;;  %v960_v23 = vsub.s32 1, %v240_v17  ;;  %p685_p8 = scmp.ne.s32.totalorder %s980_s20, %s684_s3  ;;  %p1042_p0 = scmp.ne.s32.totalorder %s1034_s22, 0 }
  0x5d   : > { %v238_v53 = vunpack.c.0.s8 %v237_v47  ;;  %s777_s7 = smov [#allocation7]  }
  0x5e   : > { %v294_v7 = vmax.f32 %v292_v4, %v293_v5  ;;  %v288_v8 = vrot.slane %v287_v6, 2  ;;  %v258_v24 = vrot.slane %v222_v22, %v958_v20  ;;  %v262_v25 = vrot.slane %v222_v22, %v960_v23  ;;  %p686_p7 = pnand %p685_p8, %p1042_p0  ;;  %s688_s8 = sshll.u32 %s777_s7, 4  ;;  %s689_s8 = int_to_ptr.vmem [resolvable:$false] %s688_s8 }
  0x5f   : > { %v241_v58 = vsub.s32 %v238_v53, %v240_v17  ;;  %s690_s18 = scalar_lea.vmem %s689_s8, 32  ;;  %p691_p10 = scmp.lt.s32.totalorder %s980_s20, %s689_s8 }
  0x60   : > { %v295_v9 = vrot.slane %v294_v7, 2  ;;  %v289_v10 = vmax.f32 %v287_v6, %v288_v8  ;;  %vm263_vm1 = vcmp.eq.s32.totalorder %v240_v17, %v258_v24  ;;  %vm264_vm2 = vcmp.eq.s32.totalorder %v240_v17, %v262_v25  ;;  %p687_p4 = pneg %p686_p7  ;;  %p692_p12 = scmp.lt.s32.totalorder %s690_s18, %s684_s3 }
  0x61   : > { %v268_v26 = vsel %vm263_vm1, %v252_v0, 0.0  ;;  %v269_v28 = vsel %vm264_vm2, %v266_v1, 0.0  ;;  %v242_v61 = vrot.slane %v235_v57, %v241_v58 }
  0x62   : > { %v296_v11 = vmax.f32 %v294_v7, %v295_v9  ;;  %v290_v12 = vrot.slane %v289_v10, 1  ;;  %v271_v31 = vsel %vm270_vm0, %v268_v26, 0.0  ;;  %v278_v34 = vsel %vm270_vm0, %v269_v28, 0.0  ;;  %p693_p1 = por %p692_p12, %p691_p10 }
  0x63   : > { %v272_v37 = vrot.slane %v271_v31, 4  ;;  %v279_v40 = vrot.slane %v278_v34, 4  ;;  %v249_v3 = vrot.slane %v242_v61, %v241_v58 }
  0x64   : > { %v297_v14 = vrot.slane %v296_v11, 1  ;;  %v291_v15 = vmax.f32 %v289_v10, %v290_v12  ;;  %v776_v12 = vmov 0.0   ;;  %p694_p2 = pnand %p693_p1, %p687_p4 }
  0x65   : > { %v273_v43 = vadd.f32 %v272_v37, %v271_v31  ;;  %v280_v48 = vadd.f32 %v279_v40, %v278_v34  ;;  %vm250_vm4 = vcmp.ne.s32.totalorder %v249_v3, 0 }
  0x66   : > { %v298_v16 = vmax.f32 %v296_v11, %v297_v14  ;;  %vm251_vm5 = vmand %vm232_vm3, %vm250_vm4 }
  0x67   : > { %v274_v51 = vrot.slane %v273_v43, 2  ;;  %v281_v54 = vrot.slane %v280_v48, 2  ;;  %v537_v14 = vsel %vm251_vm5, 1.0, %v776_v12 }
  0x68   : > { %v301_v18 = vcombine.low %v291_v15, %v298_v16 }
  0x69   : > { %v275_v55 = vadd.f32 %v274_v51, %v273_v43  ;;  %v282_v59 = vadd.f32 %v281_v54, %v280_v48 }
  0x6a   : > { %v303_v19 = vsub.f32 %v252_v0, %v301_v18  ;;  %v380_v18 = vrot.slane %v537_v14, %v958_v20 }
  0x6b   : > { %v276_v60 = vrot.slane %v275_v55, 1  ;;  %v283_v62 = vrot.slane %v282_v59, 1 }
  0x6c   : > { %v304_v21 = vmul.f32 1.442695, %v303_v19  ;;  %v384_v19 = vrot.slane %v537_v14, %v960_v23  ;;  %v387_v25 = vsel %vm361_vm6, %v380_v18, 0.0 }
  0x6d   : > { %v277_v0 = vadd.f32 %v276_v60, %v275_v55  ;;  %v284_v4 = vadd.f32 %v283_v62, %v282_v59 }
  0x6e   : > { %618 = vpow2.f32 %v304_v21  ;;  %v388_v26 = vsel %vm361_vm6, %v384_v19, 0.0 }
  0x6f   : > { %v389_v28 = vadd.f32 %v388_v26, %v387_v25 }
  0x78   : > { %v619_v27 = vpop.eup %618 }
  0x79   : > { %v307_v29 = vcombine.high %v619_v27, %v619_v27  ;;  %v309_v30 = vsel %vm270_vm0, %v619_v27, 0.0 }
  0x7a   : > { %v310_v32 = vrot.slane %v309_v30, 4 }
  0x7b   : > { %v316_v33 = vsel %vm270_vm0, %v307_v29, 0.0 }
  0x7c   : > { %v311_v35 = vadd.f32 %v310_v32, %v309_v30  ;;  %v317_v36 = vrot.slane %v316_v33, 4 }
  0x7e   : > { %v312_v38 = vrot.slane %v311_v35, 2  ;;  %v318_v39 = vadd.f32 %v317_v36, %v316_v33 }
  0x80   : > { %v313_v41 = vadd.f32 %v312_v38, %v311_v35  ;;  %v319_v42 = vrot.slane %v318_v39, 2 }
  0x82   : > { %v314_v44 = vrot.slane %v313_v41, 1  ;;  %v320_v45 = vadd.f32 %v319_v42, %v318_v39 }
  0x84   : > { %v315_v49 = vadd.f32 %v314_v44, %v313_v41  ;;  %v321_v50 = vrot.slane %v320_v45, 1  ;;  %v224_v41 = vand.u32 127, %v223_v13 }
  0x86   : > { %v322_v52 = vadd.f32 %v321_v50, %v320_v45  ;;  %620 = vlog2.f32 %v315_v49  ;;  %vm400_vm7 = vcmp.eq.s32.totalorder %v224_v41, 1  ;;  %vm399_vm8 = vcmp.eq.s32.totalorder %v224_v41, 0 }
  0x88   : > { %622 = vlog2.f32 %v322_v52 }
  0x90   : > { %v621_v63 = vpop.eup %620 }
  0x91   : > { %v324_v1 = vmul.f32 0.6931472, %v621_v63 }
  0x92   : > { %v623_v2 = vpop.eup %622 }
  0x93   : > { %v326_v5 = vmul.f32 0.6931472, %v623_v2  ;;  %v327_v6 = vadd.f32 %v324_v1, %v291_v15 }
  0x95   : > { %v328_v7 = vadd.f32 %v326_v5, %v298_v16  ;;  %v329_v8 = vsub.f32 %v327_v6, %v277_v0 }
  0x97   : > { %v330_v9 = vsub.f32 %v328_v7, %v284_v4 }
  0x99   : > { %v333_v10 = vcombine.low %v329_v8, %v330_v9 }
  0x9b   : > { %v340_v11 = vrot.slane %v333_v10, %v241_v58 }
  0x9d   : > { %v347_v17 = vrot.slane %v340_v11, %v241_v58 }
  0x9f   : > { %v349_v21 = vsel %vm251_vm5, %v347_v17, 0.0 }
  0xa0   : > { %v354_v24 = vrot.slane %v349_v21, %v958_v20  ;;  %v358_v15 = vrot.slane %v349_v21, %v960_v23 }
  0xa2   : > { %v362_v16 = vsel %vm361_vm6, %v354_v24, 0.0  ;;  %v363_v22 = vsel %vm361_vm6, %v358_v15, 0.0 }
  0xa3   : > { %v364_v27 = vadd.f32 %v363_v22, %v362_v16 }
  0xa5   : > { %365 = vadd.xlane.f32.xlu0 %v364_v27 }
  0xa9   : > { %390 = vadd.xlane.f32.xlu0 %v389_v28 }
 0x132   : > { %v366_v29 = vpop.xlane.xlu0 %365 }
 0x133   : > { %v367_v30 = vrot.slane %v366_v29, 4 }
 0x135   : > { %v368_v31 = vadd.f32 %v367_v30, %v366_v29 }
 0x136   : > { %v391_v32 = vpop.xlane.xlu0 %390 }
 0x137   : > { %v369_v33 = vrot.slane %v368_v31, 2  ;;  %v392_v34 = vrot.slane %v391_v32, 4 }
 0x139   : > { %v393_v35 = vadd.f32 %v392_v34, %v391_v32  ;;  %v370_v20 = vadd.f32 %v369_v33, %v368_v31 }
 0x13b   : > { %v394_v36 = vrot.slane %v393_v35, 2  ;;  %v371_v23 = vrot.slane %v370_v20, 1 }
 0x13d   : > { %v395_v37 = vadd.f32 %v394_v36, %v393_v35  ;;  %v372_v38 = vadd.f32 %v371_v23, %v370_v20 }
 0x13f   : > { %543 = vpush %v372_v38  ;;  %v396_v39 = vrot.slane %v395_v37, 1 }
 0x141   : > { %v397_v40 = vadd.f32 %v396_v39, %v395_v37 }
 0x143   : > { %545 = vpush %v397_v40 }
 0x170   : > { %s544_s19 = spop %543 }
 0x171   : > { %v403_v43 = vstv %s544_s19 }
 0x174   : > { %s546_s26 = spop %545 }
 0x175   : > { %v401_v42 = vstv %s546_s26 }
 0x176   : > { %v402_v44 = vsel %vm400_vm7, %v401_v42, 0.0 }
 0x177   : > { %v404_v13 = vsel %vm399_vm8, %v403_v43, %v402_v44 }
 0x178   : > { %405 = vst [vmem:[%s218_s30] sm:$0x1] %v404_v13 }
 0x179   : > { %697 = shalt.err (!%p694_p2)
}
 0x17a   : > { %s698_s15 = scalar_lea.hbm %s978_s25, 16  ;;  %s702_s5 = scalar_lea.hbm %s1029_s2, 32 }
 0x17b   : > { %p699_p9 = scmp.ne.s32.totalorder %s978_s25, %s698_s15  ;;  %p703_p6 = scmp.lt.u32.totalorder %s978_s25, %s1029_s2 }
 0x17c   : > { %p704_p13 = scmp.lt.u32.totalorder %s702_s5, %s698_s15  ;;  %p706_p8 = scmp.lt.u32.totalorder %s698_s15, %s978_s25 }
 0x17d   : > { %p700_p11 = pnand %p699_p9, %p1042_p0 }
 0x17e   : > { %p705_p5 = por %p704_p13, %p703_p6 }
 0x17f   : > { %p701_p3 = pneg %p700_p11 }
 0x180   : > { %p707_p7 = por %p706_p8, %p705_p5 }
 0x182   : > { %p708_p4 = pnand %p707_p7, %p701_p3 }
 0x184   : > { %711 = shalt.err (!%p708_p4)
}
 0x185   : > { %551 = dma.vmem_to_hbm [thread:$0]  (%p1042_p0), %s980_s20, 16, %s978_s25, %s407_s12  }
 0x186 PF: > { %s432_s21 = sand.u32 1, %s750_s9   ;;  %p1043_p10 = scmp.ne.s32.totalorder %s1035_s24, 0 }
 0x187   : > { %p1044_p12 = scmp.ge.s32.totalorder %s770_s14, 2  ;;  %s433_s19 = scalar_lea.sflag [#allocation4], %s432_s21 }
 0x189   : > { %p561_p1 = pnand %p1044_p12, %p1043_p10 }
 0x18b   : > { %745 = dma.done.wait (!%p561_p1), %s433_s19, 16  }
 0x18c   : > { %747 = vsyncadd (!%p561_p1), %s433_s19, 4294967280  ;;  %s21_s14 = sadd.s32 1, %s770_s14   ;;  %s1045_s9 = smov %s754_s10 }
 0x18d   : > { %p18_p2 = scmp.ge.s32.totalorder %s21_s14, 4   ;;  %s1046_s10 = smov %s758_s11 }
 0x18e   : > { %s1047_s11 = smov %s849_s23  ;;  %s1048_s12 = smov %s766_s13 }
 0x18f   : > { %s1049_s13 = smov %s1051_s17  ;;  %20 = sbr.rel (!%p18_p2) target bundleno = 8 (0x8), region = 86 }
 0x196   :  { %437 = vsyncpa [#allocation3], 1 }
 0x197   :  { %439 = vsyncpa [#allocation3 + $0x1], 1 }
 0x198   :  { %440 = vsyncpa [#allocation6], 1 }
 0x199   :  { %442 = vsyncpa [#allocation6 + $0x1], 1 }
 0x19a   :  { %443 = vsyncpa [#allocation4], 1 }
 0x19b   :  { %445 = vsyncpa [#allocation4 + $0x1], 1 }

</bundles_post_ra>
